<compile_context>
chip_gen: v6e
topology: v6e:2x2x1
jax: 0.10.0
libtpu: 0.0.40
codegen_flags: <defaults>
</compile_context>

<pallas_src>
import functools

import jax
import jax.numpy as jnp
import numpy as np
from jax.experimental import pallas as pl
from jax.experimental.pallas import tpu as pltpu


def _cdiv(a, b):
    return -(-a // b)


def _round_up(x, m):
    return _cdiv(x, m) * m


# ----------------------------- lane-dense 1x1 conv ---------------------------
def _conv1x1_kernel(x_ref, wt_ref, b_ref, o_ref):
    # x_ref: (1, HW, C_in)   wt_ref: (C_in, C_out)   b_ref: (1, C_out)
    # o_ref: (1, HW, C_out)  -> channel axis on lanes (lane-dense at production C_out)
    o_ref[0] = (jnp.dot(x_ref[0], wt_ref[...], preferred_element_type=jnp.float32)
                + b_ref[...])


def conv1x1_lane_dense(x_hwc, w_t, b_row):
    """nn.Conv2d(C_in, C_out, 1) with inputs pre-arranged as (B, HW, C_in)."""
    B, HW, C_in = x_hwc.shape
    C_out = w_t.shape[1]
    flops = 2 * B * HW * C_in * C_out
    bytes_accessed = 4 * (B * HW * C_in + C_in * C_out + C_out + B * HW * C_out)
    return pl.pallas_call(
        _conv1x1_kernel,
        out_shape=jax.ShapeDtypeStruct((B, HW, C_out), jnp.float32),
        grid=(B,),
        in_specs=[
            pl.BlockSpec((1, HW, C_in), lambda b: (b, 0, 0)),
            pl.BlockSpec((C_in, C_out), lambda b: (0, 0)),
            pl.BlockSpec((1, C_out), lambda b: (0, 0)),
        ],
        out_specs=pl.BlockSpec((1, HW, C_out), lambda b: (b, 0, 0)),
        compiler_params=pltpu.CompilerParams(dimension_semantics=("parallel",)),
        cost_estimate=pl.CostEstimate(flops=flops, transcendentals=0,
                                      bytes_accessed=bytes_accessed),
    )(x_hwc, w_t, b_row)


# --------------------------- fused, K-streamed head --------------------------
def _leaky_relu(y, slope):
    return jnp.where(y > 0, y, slope * y)


def _fused_head_kernel(att_ref, im_ref, q_ref, ans_ref,
                       wa_ref, wi_ref, wq_ref, ws_ref, wc_ref,
                       ba_ref, bi_ref, bq_ref, bs_ref, bc_ref,
                       pred_ref, acc_att, acc_im):
    k = pl.program_id(0)
    nk = pl.num_programs(0)

    @pl.when(k == 0)
    def _init():
        acc_att[...] = jnp.zeros_like(acc_att)
        acc_im[...] = jnp.zeros_like(acc_im)

    # Streamed partial matmuls over the K tiles (bf16 x bf16 -> f32 accumulate).
    acc_att[...] += jnp.dot(att_ref[...].astype(jnp.bfloat16), wa_ref[...],
                            preferred_element_type=jnp.float32)
    acc_im[...] += jnp.dot(im_ref[...].astype(jnp.bfloat16), wi_ref[...],
                           preferred_element_type=jnp.float32)

    @pl.when(k == nk - 1)
    def _finalize():
        att = _leaky_relu(acc_att[...] + ba_ref[...], 0.1)    # atten_input
        imf = _leaky_relu(acc_im[...] + bi_ref[...], 0.01)    # im_feat_linear (default slope)
        qf = _leaky_relu(jnp.dot(q_ref[...], wq_ref[...],
                                 preferred_element_type=jnp.float32) + bq_ref[...], 0.1)
        ans = _leaky_relu(jnp.dot(ans_ref[...], ws_ref[...],
                                  preferred_element_type=jnp.float32) + bs_ref[...], 0.1)
        # Single lane-dense (B, 4H) slab -> one MXU push against full w_corr.
        cat = jnp.concatenate([att, imf, qf, ans], axis=1)
        logit = jnp.dot(cat, wc_ref[...], preferred_element_type=jnp.float32) + bc_ref[...]
        pred_ref[...] = jax.nn.sigmoid(logit)


def fused_head(att_pad, im_pad, q_feat, ans_scores, prep, t):
    B = att_pad.shape[0]
    H = t["hidden"]
    Dq = q_feat.shape[1]
    Da = ans_scores.shape[1]
    nk, tka, tki = t["nk"], t["tk_att"], t["tk_im"]

    flops = 2 * B * H * (t["ka_pad"] + t["ki_pad"] + Dq + Da + 4)
    bytes_accessed = (2 * H * (t["ka_pad"] + t["ki_pad"])            # bf16 streamed weights
                      + 4 * H * (Dq + Da + 4 + 5)                    # small f32 weights/biases
                      + 4 * B * (t["ka_pad"] + t["ki_pad"] + Dq + Da + 1))

    return pl.pallas_call(
        _fused_head_kernel,
        out_shape=jax.ShapeDtypeStruct((B, 1), jnp.float32),
        grid=(nk,),
        in_specs=[
            pl.BlockSpec((B, tka), lambda k: (0, k)),      # attention activation (streamed)
            pl.BlockSpec((B, tki), lambda k: (0, k)),      # conv-feature activation (streamed)
            pl.BlockSpec((B, Dq), lambda k: (0, 0)),       # q_feat (resident)
            pl.BlockSpec((B, Da), lambda k: (0, 0)),       # ans_scores (resident)
            pl.BlockSpec((tka, H), lambda k: (k, 0)),      # w_att tile (bf16, streamed)
            pl.BlockSpec((tki, H), lambda k: (k, 0)),      # w_im tile (bf16, streamed)
            pl.BlockSpec((Dq, H), lambda k: (0, 0)),       # w_q
            pl.BlockSpec((Da, H), lambda k: (0, 0)),       # w_ans
            pl.BlockSpec((4 * H, 1), lambda k: (0, 0)),    # w_corr
            pl.BlockSpec((1, H), lambda k: (0, 0)),        # b_att
            pl.BlockSpec((1, H), lambda k: (0, 0)),        # b_im
            pl.BlockSpec((1, H), lambda k: (0, 0)),        # b_q
            pl.BlockSpec((1, H), lambda k: (0, 0)),        # b_ans
            pl.BlockSpec((1, 1), lambda k: (0, 0)),        # b_corr
        ],
        out_specs=pl.BlockSpec((B, 1), lambda k: (0, 0)),
        scratch_shapes=[pltpu.VMEM((B, H), jnp.float32),   # attention accumulator
                        pltpu.VMEM((B, H), jnp.float32)],  # im-feature accumulator
        compiler_params=pltpu.CompilerParams(
            dimension_semantics=("arbitrary",),            # K reduction axis
            vmem_limit_bytes=64 * 1024 * 1024),
        cost_estimate=pl.CostEstimate(flops=flops, transcendentals=B,
                                      bytes_accessed=bytes_accessed),
    )(att_pad, im_pad, q_feat, ans_scores,
      prep["w_att"], prep["w_im"], prep["w_q"], prep["w_ans"], prep["w_corr"],
      prep["b_att"], prep["b_im"], prep["b_q"], prep["b_ans"], prep["b_corr"])


# ------------------------------ parameter prep --------------------------------
def prepare_params(raw, *, tk_att_max=8192):
    """Offline transform of the PyTorch-layout params for the TPU kernels.

    - w_im rows permuted from (C,H,W)-flatten to (H,W,C)-flatten order (matches the
      lane-dense conv output), large weights cast to bf16 and zero-padded to the K tiling.
    - w_conv transposed to (C_in, C_out) so the conv output is channel-on-lanes.
    tk_att_max sizes the streamed K tile; ~8192 keeps the double-buffered bf16 weight
    tiles at a few MiB, safe for v7x's 64 MiB VMEM (can be raised on v5e/v6e).
    """
    hidden = raw["b_att"].shape[-1]
    atten_dim = raw["w_att"].shape[0]
    c_out = raw["w_conv"].shape[0]
    im_dim = raw["w_im"].shape[0]
    hw = im_dim // c_out

    tk_att = min(_round_up(atten_dim, 128), _round_up(tk_att_max, 128))
    nk = _cdiv(atten_dim, tk_att)
    ka_pad = nk * tk_att
    tk_im = _round_up(_cdiv(im_dim, nk), 128)
    ki_pad = nk * tk_im

    w_im_hwc = raw["w_im"].reshape(c_out, hw, hidden).transpose(1, 0, 2).reshape(im_dim, hidden)

    prep = dict(
        w_att=jnp.pad(raw["w_att"], ((0, ka_pad - atten_dim), (0, 0))).astype(jnp.bfloat16),
        w_im=jnp.pad(w_im_hwc, ((0, ki_pad - im_dim), (0, 0))).astype(jnp.bfloat16),
        w_q=raw["w_q"], w_ans=raw["w_ans"], w_corr=raw["w_corr"],
        b_att=raw["b_att"], b_im=raw["b_im"], b_q=raw["b_q"],
        b_ans=raw["b_ans"], b_corr=raw["b_corr"],
        # conv weights kept f32 (small vs w_att) so the returned im_feature is exact.
        w_conv_t=jnp.transpose(raw["w_conv"], (1, 0)),     # (C_in, C_out)
        b_conv=raw["b_conv"].reshape(1, c_out),
    )
    tiling = dict(nk=nk, tk_att=tk_att, ka_pad=ka_pad, tk_im=tk_im, ki_pad=ki_pad,
                  atten_dim=atten_dim, im_dim=im_dim, hw=hw, c_out=c_out, hidden=hidden)
    return prep, tiling


# --------------------------------- forward ------------------------------------
def uncertain_attention_net_cam_forward(prep, tiling, attention, im_feat, q_feat, ans_scores):
    t = tiling
    B, C_in, Hs, Ws = im_feat.shape
    HW = Hs * Ws

    # im_feat_in (1x1 conv), lane-dense: (HW, C_in) @ (C_in, C_out) per batch.
    x_hwc = jnp.transpose(im_feat, (0, 2, 3, 1)).reshape(B, HW, C_in)
    conv_out = conv1x1_lane_dense(x_hwc, prep["w_conv_t"], prep["b_conv"])   # (B, HW, C_out)

    # Returned feature in PyTorch NCHW layout (same values as nn.Conv2d output).
    im_feats_feature = jnp.transpose(conv_out, (0, 2, 1)).reshape(B, t["c_out"], Hs, Ws)

    # (H,W,C)-flatten activation for the head (w_im rows were permuted to match).
    im_flat = conv_out.reshape(B, HW * t["c_out"])

    # Zero-pad activations up to the K-tiling (padded weight rows are zero too).
    att_pad = jnp.pad(attention, ((0, 0), (0, t["ka_pad"] - t["atten_dim"])))
    im_pad = jnp.pad(im_flat, ((0, 0), (0, t["ki_pad"] - t["im_dim"])))

    pred = fused_head(att_pad, im_pad, q_feat, ans_scores, prep, t)
    return {"wrong_pred": pred, "im_feature": [im_feats_feature]}


# ----------------------------- reference (plain JAX) ---------------------------
def reference_forward(raw, attention, im_feat, q_feat, ans_scores):
    """Plain-JAX reference in the original PyTorch layout.  The att/im linear layers
    mirror the kernel's bf16 weight+activation rounding (a documented perf tradeoff)
    so the comparison is tight; everything else is f32."""
    B = im_feat.shape[0]
    imff = (jnp.einsum("oc,bchw->bohw", raw["w_conv"], im_feat)
            + raw["b_conv"][None, :, None, None])
    im_flat = imff.reshape(B, -1)                       # (C,H,W) flatten, like .view(B, -1)

    def lin_lr(x, w, b, slope, bf16=False):
        if bf16:
            x = x.astype(jnp.bfloat16).astype(jnp.float32)
            w = w.astype(jnp.bfloat16).astype(jnp.float32)
        y = x @ w + b
        return jnp.where(y > 0, y, slope * y)

    att = lin_lr(attention, raw["w_att"], raw["b_att"], 0.1, bf16=True)
    imf = lin_lr(im_flat, raw["w_im"], raw["b_im"], 0.01, bf16=True)
    qf = lin_lr(q_feat, raw["w_q"], raw["b_q"], 0.1)
    ans = lin_lr(ans_scores, raw["w_ans"], raw["b_ans"], 0.1)
    cat = jnp.concatenate([att, imf, qf, ans], axis=1)
    pred = jax.nn.sigmoid(cat @ raw["w_corr"] + raw["b_corr"])
    return {"wrong_pred": pred, "im_feature": [imff]}


# ------------------------------- parameter init --------------------------------
def init_params(key, atten_dim, hidden, q_dim, ans_dim, im_hw, c_in, c_out):
    keys = jax.random.split(key, 6)

    def lin(k, fin, fout):
        kw, kb = jax.random.split(k)
        bound = 1.0 / float(np.sqrt(fin))
        w = jax.random.uniform(kw, (fin, fout), jnp.float32, -bound, bound)
        b = jax.random.uniform(kb, (1, fout), jnp.float32, -bound, bound)
        return w, b

    im_flat_dim = im_hw[0] * im_hw[1] * c_out
    w_att, b_att = lin(keys[0], atten_dim, hidden)
    w_im, b_im = lin(keys[1], im_flat_dim, hidden)
    w_q, b_q = lin(keys[2], q_dim, hidden)
    w_ans, b_ans = lin(keys[3], ans_dim, hidden)
    w_corr, b_corr = lin(keys[4], hidden * 4, 1)

    kcw, kcb = jax.random.split(keys[5])
    cbound = 1.0 / float(np.sqrt(c_in))
    w_conv = jax.random.uniform(kcw, (c_out, c_in), jnp.float32, -cbound, cbound)
    b_conv = jax.random.uniform(kcb, (c_out,), jnp.float32, -cbound, cbound)

    return dict(w_att=w_att, b_att=b_att, w_im=w_im, b_im=b_im,
                w_q=w_q, b_q=b_q, w_ans=w_ans, b_ans=b_ans,
                w_corr=w_corr, b_corr=b_corr,
                w_conv=w_conv, b_conv=b_conv)


# ----------------------------------- main --------------------------------------
if __name__ == "__main__":
    # Small shapes consistent with the module's forward structure.
    B = 2
    atten_dim = 500       # stands in for 4*12*115*115 (non-multiple of 128 -> pad path)
    hidden = 32           # hidden_feat_size
    q_dim = 64            # q_feat_dim
    ans_dim = 128         # ans_dim
    im_h, im_w, c_in = 4, 4, 64    # im_feat_dim (spatial, spatial, channels)
    c_out = 24            # stands in for the 1024-channel conv output (pad path for im)

    key = jax.random.PRNGKey(0)
    kp, ka, ki, kq, ks = jax.random.split(key, 5)
    raw = init_params(kp, atten_dim, hidden, q_dim, ans_dim, (im_h, im_w), c_in, c_out)
    # tk_att_max=128 so the toy shapes still exercise the multi-step K-streaming path.
    prep, tiling = prepare_params(raw, tk_att_max=128)

    attention = jax.random.normal(ka, (B, atten_dim), jnp.float32)
    im_feat = jax.random.normal(ki, (B, c_in, im_h, im_w), jnp.float32)   # NCHW
    q_feat = jax.random.normal(kq, (B, q_dim), jnp.float32)
    ans_scores = jax.random.normal(ks, (B, ans_dim), jnp.float32)

    out = uncertain_attention_net_cam_forward(prep, tiling, attention, im_feat,
                                              q_feat, ans_scores)
    out = jax.block_until_ready(out)

    ref = reference_forward(raw, attention, im_feat, q_feat, ans_scores)
    np.testing.assert_allclose(np.asarray(out["wrong_pred"]),
                               np.asarray(ref["wrong_pred"]), rtol=2e-3, atol=2e-3)
    np.testing.assert_allclose(np.asarray(out["im_feature"][0]),
                               np.asarray(ref["im_feature"][0]), rtol=2e-3, atol=2e-3)

    print("KERNEL_OK")
</pallas_src>

<mosaic_0001>
module attributes {stable_mosaic.version = 11 : i64} {
  func.func @_conv1x1_kernel(%arg0: i32, %arg1: memref<1x16x64xf32, #tpu.memory_space<vmem>>, %arg2: memref<64x24xf32, #tpu.memory_space<vmem>>, %arg3: memref<1x24xf32, #tpu.memory_space<vmem>>, %arg4: memref<1x16x24xf32, #tpu.memory_space<vmem>>) attributes {dimension_semantics = [#tpu.dimension_semantics<parallel>], iteration_bounds = array<i64: 2>, scalar_prefetch = 0 : i64, scratch_operands = 0 : i64, tpu.core_type = #tpu.core_type<tc>, window_params = [{transform_indices = @transform_0, window_bounds = array<i64: 1, 16, 64>}, {pipeline_mode = #tpu.pipeline_mode<synchronous>, transform_indices = @transform_1, window_bounds = array<i64: 64, 24>}, {pipeline_mode = #tpu.pipeline_mode<synchronous>, transform_indices = @transform_2, window_bounds = array<i64: 1, 24>}, {transform_indices = @transform_3, window_bounds = array<i64: 1, 16, 24>}]} {
    %c0 = arith.constant 0 : index
    %c0_0 = arith.constant 0 : index
    %c0_1 = arith.constant 0 : index
    %0 = vector.load %arg1[%c0, %c0_0, %c0_1] : memref<1x16x64xf32, #tpu.memory_space<vmem>>, vector<1x16x64xf32>
    %1 = vector.shape_cast %0 : vector<1x16x64xf32> to vector<16x64xf32>
    %c0_2 = arith.constant 0 : index
    %c0_3 = arith.constant 0 : index
    %2 = vector.load %arg2[%c0_2, %c0_3] : memref<64x24xf32, #tpu.memory_space<vmem>>, vector<64x24xf32>
    %cst = arith.constant dense<0.000000e+00> : vector<16x24xf32>
    %3 = tpu.matmul %1, %2, %cst {dimension_numbers = #tpu.dot_dimension_numbers<[1], [0], [0], [1], [0, 0, 1, 1], [], []>} : vector<16x64xf32>, vector<64x24xf32>, vector<16x24xf32> -> vector<16x24xf32>
    %c0_4 = arith.constant 0 : index
    %c0_5 = arith.constant 0 : index
    %4 = vector.load %arg3[%c0_4, %c0_5] : memref<1x24xf32, #tpu.memory_space<vmem>>, vector<1x24xf32>
    %5 = vector.broadcast %4 : vector<1x24xf32> to vector<16x24xf32>
    %6 = arith.addf %3, %5 : vector<16x24xf32>
    %c0_6 = arith.constant 0 : index
    %c0_7 = arith.constant 0 : index
    %c0_8 = arith.constant 0 : index
    %7 = vector.load %arg4[%c0_6, %c0_7, %c0_8] : memref<1x16x24xf32, #tpu.memory_space<vmem>>, vector<1x16x24xf32>
    %8 = vector.shape_cast %7 : vector<1x16x24xf32> to vector<16x24xf32>
    %9 = vector.shape_cast %6 : vector<16x24xf32> to vector<1x16x24xf32>
    tpu.vector_store %arg4[%c0_6, %c0_7, %c0_8], %9 {strides = array<i32>} : memref<1x16x24xf32, #tpu.memory_space<vmem>>, vector<1x16x24xf32>,
    return
  }
  func.func @transform_0(%arg0: i32) -> (i32, i32, i32) {
    %c0_i32 = arith.constant 0 : i32
    %c0_i32_0 = arith.constant 0 : i32
    %c0_i32_1 = arith.constant 0 : i32
    return %arg0, %c0_i32, %c0_i32_0 : i32, i32, i32
  }
  func.func @transform_1(%arg0: i32) -> (i32, i32) {
    %c0_i32 = arith.constant 0 : i32
    %c0_i32_0 = arith.constant 0 : i32
    %c0_i32_1 = arith.constant 0 : i32
    return %c0_i32, %c0_i32_0 : i32, i32
  }
  func.func @transform_2(%arg0: i32) -> (i32, i32) {
    %c0_i32 = arith.constant 0 : i32
    %c0_i32_0 = arith.constant 0 : i32
    %c0_i32_1 = arith.constant 0 : i32
    return %c0_i32, %c0_i32_0 : i32, i32
  }
  func.func @transform_3(%arg0: i32) -> (i32, i32, i32) {
    %c0_i32 = arith.constant 0 : i32
    %c0_i32_0 = arith.constant 0 : i32
    %c0_i32_1 = arith.constant 0 : i32
    return %arg0, %c0_i32, %c0_i32_0 : i32, i32, i32
  }
}

</mosaic_0001>

<bundles_post_ra>
// kernel: tpu_custom_call.1
= control target key start
LH: loop header
LB: loop body
LE: loop exit
PB: predicated region body
PF: predicated region fallthrough
CT: control target
= control target key end

     0   :  { %8 = vsyncpa [#allocation3], 0  ;;  %s650_s0 = inlined_call_operand.vmem [shape: f32[2,16,64], index: 0, kind: input, shape index: {}]   ;;  %s651_s1 = inlined_call_operand.vmem [shape: f32[64,24], index: 1, kind: input, shape index: {}]   ;;  %s652_s2 = inlined_call_operand.vmem [shape: f32[1,24], index: 2, kind: input, shape index: {}]   ;;  %s653_s3 = inlined_call_operand.hbm [shape: f32[2,16,24], index: 3, kind: output, shape index: {}]  }
   0x1   :  { %10 = vsyncpa [#allocation3 + $0x1], 0  ;;  %s519_s12 = smov 0   ;;  %s521_s13 = smov 0  }
   0x2   :  { %s523_s14 = smov 0   ;;  %s525_s15 = smov 0  }
   0x3 LB: > { %s540_s16 = sadd.s32 4294967295, %s494_s15   ;;  %s347_s17 = sadd.s32 4294967294, %s494_s15   ;;  %s494_s15 = sphi %s525_s15, %s659_s15   ;;  %s490_s14 = sphi %s523_s14, %s658_s14   ;;  %s486_s13 = sphi %s521_s13, %s657_s13   ;;  %s482_s12 = sphi %s519_s12, %s656_s12  }
   0x4   : > { %s544_s18 = sadd.s32 1, %s494_s15   ;;  %s91_s19 = sadd.s32 1, %s490_s14 }
   0x5   : > { %s88_s20 = ssub.s32 %s494_s15, %s544_s18  ;;  %p101_p0 = scmp.ne.s32.totalorder %s490_s14, %s486_s13 }
   0x6   : > { %p89_p1 = scmp.eq.s32.totalorder %s88_s20, 0  ;;  %p102_p2 = scmp.eq.s32.totalorder %s540_s16, 1 }
   0x7   : > { %p107_p3 = scmp.ne.s32.totalorder %s486_s13, %s482_s12  ;;  %p108_p4 = scmp.eq.s32.totalorder %s347_s17, 1 }
   0x8   : > { %s555_s21 = scalar_select %p89_p1, %s490_s14, %s91_s19  }
   0x9   : > { %p557_p5 = por %p102_p2, %p101_p0  ;;  %p561_p6 = por %p108_p4, %p107_p3 }
   0xa   : > { %p350_p7 = scmp.ge.s32.totalorder %s494_s15, 1  ;;  %p140_p8 = scmp.lt.s32.totalorder %s494_s15, 3 }
   0xc   : > { %p141_p9 = pnand %p350_p7, %p140_p8 }
   0xd   : > { %p164_p10 = scmp.lt.s32.totalorder (!%p141_p9), %s540_s16, 1  ;;  %s161_s27 = sand.u32 (!%p141_p9), 1, %s486_s13  }
   0xe   : > { %144 = sbr.rel (%p141_p9) target bundleno = 247 (0xf7), region = 32  ;;  %s351_s28 = sshll.u32 (!%p141_p9), %s161_s27, 4 }
   0xf   : > { %s163_s4 = scalar_lea.vmem (!%p141_p9), [#allocation2], %s351_s28  ;;  %s610_s10 = scalar_lea.sflag (!%p141_p9), [#allocation3], %s161_s27 }
  0x10   : > { %s285_s5 = sshll.u32 (!%p141_p9), %s163_s4, 4  ;;  %s496_s11 = smov (!%p141_p9), [#allocation2]   ;;  %s603_s5 = int_to_ptr.vmem [resolvable:$true] %s285_s5 }
  0x11   : > { %s438_s17 = sshll.u32 (!%p141_p9), %s496_s11, 4  ;;  %s439_s17 = int_to_ptr.vmem [resolvable:$false] %s438_s17 }
  0x12   : > { %s440_s19 = scalar_lea.vmem (!%p141_p9), %s439_s17, 512  ;;  %p441_p0 = scmp.lt.s32.totalorder (!%p141_p9), %s603_s5, %s439_s17 }
  0x13   : > { %v178_v0 = vld [vmem:[%s651_s1 + $0x38] sm:$0xff]  ;;  %v177_v1 = vld [vmem:[%s651_s1 + $0x30] sm:$0xff]  ;;  %v176_v2 = vld [vmem:[%s651_s1 + $0x28] sm:$0xff]  ;;  %s165_s30 = scalar_select %p164_p10, %s540_s16, 1  ;;  %vm186_vm0 = vcmask 523264   ;;  %vm268_vm1 = vcmask 195584  }
  0x14   : > { %374 = vmatprep.subr.mxu0 %v178_v0  ;;  %v175_v3 = vld [vmem:[%s651_s1 + $0x20] sm:$0xff]  ;;  %v174_v4 = vld [vmem:[%s651_s1 + $0x18] sm:$0xff]  ;;  %v173_v6 = vld [vmem:[%s651_s1 + $0x10] sm:$0xff] }
  0x15   : > { %375 = vmatpush3.msra.mxu0 %v178_v0  ;;  %s362_s6 = sshll.u32 %s165_s30, 4  ;;  %v172_v7 = vld [vmem:[%s651_s1 + $0x8] sm:$0xff]  ;;  %v171_v8 = vld [vmem:[%s651_s1] sm:$0xff] }
  0x16   : > { %376 = vmatprep.subr.mxu0 %v177_v1  ;;  %s168_s9 = scalar_lea.vmem %s650_s0, %s362_s6  ;;  %v354_v10 = vld [vmem:[%s652_s2] ss:$0 sm:$0xff]  ;;  %s363_s6 = sshll.u32 %s540_s16, 8 }
  0x17   : > { %377 = vmatpush3.msra.mxu0 %v177_v1  ;;  %v169_v5 = vld [vmem:[%s168_s9] sm:$0xff]  ;;  %v170_v9 = vld [vmem:[%s168_s9 + $0x8] sm:$0xff]  ;;  %s608_s9 = scalar_lea.hbm %s653_s3, %s363_s6  ;;  %s434_s16 = scalar_lea.vmem %s603_s5, 256 }
  0x18   : > { %378 = vmatprep.subr.mxu0 %v176_v2  ;;  %390 = vmatprep.mubr.msk.f32.mxu0 %vm186_vm0, %v169_v5  ;;  %p435_p11 = scmp.ne.s32.totalorder %s603_s5, %s434_s16  ;;  %p442_p1 = scmp.lt.s32.totalorder %s440_s19, %s434_s16 }
  0x19   : > { %379 = vmatpush3.msra.mxu0 %v176_v2 }
  0x1a   : > { %380 = vmatprep.subr.mxu0 %v175_v3  ;;  %p436_p12 = pnand %p435_p11, %p557_p5  ;;  %p443_p2 = por %p442_p1, %p441_p0 }
  0x1b   : > { %381 = vmatpush3.msra.mxu0 %v175_v3 }
  0x1c   : > { %382 = vmatprep.subr.mxu0 %v174_v4  ;;  %p437_p13 = pneg %p436_p12 }
  0x1d   : > { %383 = vmatpush3.msra.mxu0 %v174_v4 }
  0x1e   : > { %384 = vmatprep.subr.mxu0 %v173_v6  ;;  %p444_p3 = pnand %p443_p2, %p437_p13 }
  0x1f   : > { %385 = vmatpush3.msra.mxu0 %v173_v6 }
  0x20   : > { %386 = vmatprep.subr.mxu0 %v172_v7 }
  0x21   : > { %387 = vmatpush3.msra.mxu0 %v172_v7 }
  0x22   : > { %388 = vmatprep.subr.mxu0 %v171_v8 }
  0x23   : > { %389 = vmatpush3.msra.mxu0 %v171_v8 }
  0x24   : > { %391 = vmatmul.mubr.msk.f32.vlgmr.msra.gmra.mxu0 %vm186_vm0, %v170_v9 }
  0xe4   : > { %v392_v11 = vpop.f32.mrf.mxu0 }
  0xe5   : > { %v265_v12 = vadd.f32 %v392_v11, %v354_v10 }
  0xe6   : > { %v259_v13 = vpop.f32.mrf.mxu0 }
  0xe7   : > { %270 = vst.msk [vmem:[%s163_s4 + $0x8] sm:$0xff] %vm268_vm1, %v265_v12  ;;  %v260_v14 = vadd.f32 %v354_v10, %v259_v13 }
  0xe9   : > { %269 = vst.msk [vmem:[%s163_s4] sm:$0xff] %vm268_vm1, %v260_v14 }
  0xea   : > { %447 = shalt.err (!%p444_p3)
}
  0xeb   : > { %s448_s20 = scalar_lea.hbm %s608_s9, 256  ;;  %s452_s26 = scalar_lea.hbm %s653_s3, 512 }
  0xec   : > { %p449_p4 = scmp.ne.s32.totalorder %s608_s9, %s448_s20  ;;  %p453_p9 = scmp.lt.s32.totalorder %s608_s9, %s653_s3 }
  0xed   : > { %p454_p10 = scmp.lt.s32.totalorder %s452_s26, %s448_s20 }
  0xee   : > { %p450_p7 = pnand %p449_p4, %p557_p5 }
  0xef   : > { %p455_p11 = por %p454_p10, %p453_p9 }
  0xf0   : > { %p451_p8 = pneg %p450_p7 }
  0xf2   : > { %p456_p12 = pnand %p455_p11, %p451_p8 }
  0xf4   : > { %459 = shalt.err (!%p456_p12)
}
  0xf5   : > { %s497_s29 = smov 128   ;;  %s498_s30 = smov 8  }
  0xf6   : > { %393 = dma.vmem_to_hbm [thread:$0]  (%p557_p5), %s603_s5, 256, %s608_s9, %s610_s10, %s497_s29, %s497_s29, %s498_s30  }
  0xf7 PF: > { %p399_p13 = scmp.ge.s32.totalorder %s494_s15, 2  ;;  %s300_s4 = sand.u32 1, %s482_s12  }
  0xf8   : > { %s301_s6 = scalar_lea.sflag [#allocation3], %s300_s4 }
  0xf9   : > { %p396_p0 = pnand %p399_p13, %p561_p6 }
  0xfb   : > { %p397_p1 = pneg %p396_p0 }
  0xfd   : > { %477 = dma.done.wait (%p397_p1), %s301_s6, 256  }
  0xfe   : > { %479 = vsyncadd (%p397_p1), %s301_s6, 4294967040  ;;  %p13_p2 = scmp.ge.s32.totalorder %s544_s18, 4   ;;  %s656_s12 = smov %s486_s13 }
  0xff   : > { %s657_s13 = smov %s490_s14  ;;  %s658_s14 = smov %s555_s21 }
 0x100   : > { %s659_s15 = smov %s544_s18  ;;  %15 = sbr.rel (!%p13_p2) target bundleno = 3 (0x3), region = 67 }
 0x105   :  { %306 = vsyncpa [#allocation3], 1 }
 0x106   :  { %308 = vsyncpa [#allocation3 + $0x1], 1 }

</bundles_post_ra>
